<compile_context>
chip_gen: v7x
topology: tpu7x:2x2x1
jax: 0.10.0
libtpu: 0.0.40
codegen_flags: <defaults>
</compile_context>

<pallas_src>
import functools

import jax
import jax.numpy as jnp
from jax.experimental import pallas as pl
from jax.experimental.pallas import tpu as pltpu


def _mlp_kernel(x_ref, w0_ref, b0_ref, w1_ref, b1_ref, w2_ref, b2_ref, o_ref):
    """One batch tile of the fused 3-layer MLP.

    Shapes (batch on the lane axis):
      x_ref : [12, TILE_B]
      h0,h1 : [7,  TILE_B]
      o_ref : [1,  TILE_B]
    """
    x = x_ref[...]

    # dense0 + ReLU   (dropout0 == identity in eval mode)
    h0 = jnp.dot(w0_ref[...], x, preferred_element_type=jnp.float32)   # [7, TILE_B]
    h0 = jnp.maximum(h0 + b0_ref[...], 0.0)

    # dense1 + ReLU   (dropout1 == identity in eval mode)
    h1 = jnp.dot(w1_ref[...], h0, preferred_element_type=jnp.float32)  # [7, TILE_B]
    h1 = jnp.maximum(h1 + b1_ref[...], 0.0)

    # dense2 (output logit, no activation)
    out = jnp.dot(w2_ref[...], h1, preferred_element_type=jnp.float32)  # [1, TILE_B]
    o_ref[...] = out + b2_ref[...]


def _round_up(n, m):
    return ((n + m - 1) // m) * m


@functools.partial(jax.jit, static_argnames=("max_tile_b",))
def classificador_forward(x, params, *, max_tile_b=16384):
    """Forward pass.

    Args:
      x: [B, 12] float32 features.
      params: dict with weights stored PyTorch-style [out, in] and biases
        stored [out, 1] (so they broadcast along the lane/batch axis).
      max_tile_b: upper bound on rows per grid step (multiple of 128).

    Returns:
      [B, 1] float32 logits — same semantics as the PyTorch module in eval
      mode.
    """
    B, in_f = x.shape  # in_f == 12

    # Choose a lane-dense tile (multiple of 128): as large as max_tile_b, but
    # balanced across grid steps so padding waste stays small for any B.
    num_tiles = pl.cdiv(B, max_tile_b)
    tile_b = min(max_tile_b, _round_up(pl.cdiv(B, num_tiles), 128))
    padded_b = num_tiles * tile_b

    # Batch onto the lane axis; pad (pad columns compute garbage logits that
    # are sliced off — every column is independent).
    x_t = x.T                                                  # [12, B]
    if padded_b != B:
        x_t = jnp.pad(x_t, ((0, 0), (0, padded_b - B)))        # [12, padded_b]

    const_map = lambda i: (0, 0)
    out_t = pl.pallas_call(
        _mlp_kernel,
        out_shape=jax.ShapeDtypeStruct((1, padded_b), jnp.float32),
        grid=(num_tiles,),
        in_specs=[
            pl.BlockSpec((in_f, tile_b), lambda i: (0, i)),    # x tile (pipelined)
            pl.BlockSpec((7, in_f), const_map),                # w0 (VMEM-resident)
            pl.BlockSpec((7, 1), const_map),                   # b0
            pl.BlockSpec((7, 7), const_map),                   # w1
            pl.BlockSpec((7, 1), const_map),                   # b1
            pl.BlockSpec((1, 7), const_map),                   # w2
            pl.BlockSpec((1, 1), const_map),                   # b2
        ],
        out_specs=pl.BlockSpec((1, tile_b), lambda i: (0, i)), # lane-dense store
        compiler_params=pltpu.CompilerParams(
            dimension_semantics=("parallel",),
        ),
    )(
        x_t,
        params["w0"], params["b0"],
        params["w1"], params["b1"],
        params["w2"], params["b2"],
    )

    # Back to [B, 1] (drop pad columns).
    return out_t[:, :B].T


def init_params(key):
    """Deterministic init mirroring the PyTorch module.

    PyTorch: weights ~ U(0, 1) via torch.nn.init.uniform_ with shape
    [out, in]; biases keep the default nn.Linear init
    U(-1/sqrt(fan_in), +1/sqrt(fan_in)).  Weights kept in [out, in] layout;
    biases stored as [out, 1] to broadcast along the lane (batch) axis.
    """
    k = jax.random.split(key, 6)

    def bias(kb, fan_in, n_out):
        bound = 1.0 / jnp.sqrt(fan_in)
        return jax.random.uniform(kb, (n_out, 1), jnp.float32, -bound, bound)

    return {
        "w0": jax.random.uniform(k[0], (7, 12), jnp.float32, 0.0, 1.0),
        "b0": bias(k[1], 12.0, 7),
        "w1": jax.random.uniform(k[2], (7, 7), jnp.float32, 0.0, 1.0),
        "b1": bias(k[3], 7.0, 7),
        "w2": jax.random.uniform(k[4], (1, 7), jnp.float32, 0.0, 1.0),
        "b2": bias(k[5], 7.0, 1),
    }


def _reference_forward(x, params):
    h0 = jnp.maximum(x @ params["w0"].T + params["b0"].T, 0.0)
    h1 = jnp.maximum(h0 @ params["w1"].T + params["b1"].T, 0.0)
    return h1 @ params["w2"].T + params["b2"].T


if __name__ == "__main__":
    key = jax.random.PRNGKey(0)
    k_x, k_p = jax.random.split(key)

    B = 4
    x = jax.random.normal(k_x, (B, 12), jnp.float32)
    params = init_params(k_p)

    out = classificador_forward(x, params)
    out = jax.block_until_ready(out)

    ref = _reference_forward(x, params)
    assert out.shape == (B, 1), out.shape
    assert jnp.allclose(out, ref, atol=1e-4, rtol=1e-4), (out, ref)

    # Also exercise a non-tile-aligned, multi-tile batch path.
    B2 = 300
    x2 = jax.random.normal(jax.random.PRNGKey(1), (B2, 12), jnp.float32)
    out2 = jax.block_until_ready(classificador_forward(x2, params, max_tile_b=128))
    ref2 = _reference_forward(x2, params)
    assert out2.shape == (B2, 1), out2.shape
    assert jnp.allclose(out2, ref2, atol=1e-4, rtol=1e-4)

    print("KERNEL_OK")
</pallas_src>

<mosaic_0001>
module attributes {stable_mosaic.version = 11 : i64} {
  func.func @_mlp_kernel(%arg0: i32, %arg1: memref<12x128xf32, #tpu.memory_space<vmem>>, %arg2: memref<7x12xf32, #tpu.memory_space<vmem>>, %arg3: memref<7x1xf32, #tpu.memory_space<vmem>>, %arg4: memref<7x7xf32, #tpu.memory_space<vmem>>, %arg5: memref<7x1xf32, #tpu.memory_space<vmem>>, %arg6: memref<1x7xf32, #tpu.memory_space<vmem>>, %arg7: memref<1x1xf32, #tpu.memory_space<vmem>>, %arg8: memref<1x128xf32, #tpu.memory_space<vmem>>) attributes {dimension_semantics = [#tpu.dimension_semantics<parallel>], iteration_bounds = array<i64: 1>, scalar_prefetch = 0 : i64, scratch_operands = 0 : i64, tpu.core_type = #tpu.core_type<tc>, window_params = [{transform_indices = @transform_0, window_bounds = array<i64: 12, 128>}, {pipeline_mode = #tpu.pipeline_mode<synchronous>, transform_indices = @transform_1, window_bounds = array<i64: 7, 12>}, {pipeline_mode = #tpu.pipeline_mode<synchronous>, transform_indices = @transform_2, window_bounds = array<i64: 7, 1>}, {pipeline_mode = #tpu.pipeline_mode<synchronous>, transform_indices = @transform_3, window_bounds = array<i64: 7, 7>}, {pipeline_mode = #tpu.pipeline_mode<synchronous>, transform_indices = @transform_4, window_bounds = array<i64: 7, 1>}, {pipeline_mode = #tpu.pipeline_mode<synchronous>, transform_indices = @transform_5, window_bounds = array<i64: 1, 7>}, {pipeline_mode = #tpu.pipeline_mode<synchronous>, transform_indices = @transform_6, window_bounds = array<i64: 1, 1>}, {transform_indices = @transform_7, window_bounds = array<i64: 1, 128>}]} {
    %c0 = arith.constant 0 : index
    %c0_0 = arith.constant 0 : index
    %0 = vector.load %arg1[%c0, %c0_0] : memref<12x128xf32, #tpu.memory_space<vmem>>, vector<12x128xf32>
    %c0_1 = arith.constant 0 : index
    %c0_2 = arith.constant 0 : index
    %1 = vector.load %arg2[%c0_1, %c0_2] : memref<7x12xf32, #tpu.memory_space<vmem>>, vector<7x12xf32>
    %cst = arith.constant dense<0.000000e+00> : vector<7x128xf32>
    %2 = tpu.matmul %1, %0, %cst {dimension_numbers = #tpu.dot_dimension_numbers<[1], [0], [0], [1], [0, 0, 1, 1], [], []>} : vector<7x12xf32>, vector<12x128xf32>, vector<7x128xf32> -> vector<7x128xf32>
    %c0_3 = arith.constant 0 : index
    %c0_4 = arith.constant 0 : index
    %3 = vector.load %arg3[%c0_3, %c0_4] : memref<7x1xf32, #tpu.memory_space<vmem>>, vector<7x1xf32>
    %4 = vector.broadcast %3 : vector<7x1xf32> to vector<7x128xf32>
    %5 = arith.addf %2, %4 : vector<7x128xf32>
    %cst_5 = arith.constant 0.000000e+00 : f32
    %6 = vector.broadcast %cst_5 : f32 to vector<7x128xf32>
    %7 = arith.maximumf %5, %6 : vector<7x128xf32>
    %c0_6 = arith.constant 0 : index
    %c0_7 = arith.constant 0 : index
    %8 = vector.load %arg4[%c0_6, %c0_7] : memref<7x7xf32, #tpu.memory_space<vmem>>, vector<7x7xf32>
    %cst_8 = arith.constant dense<0.000000e+00> : vector<7x128xf32>
    %9 = tpu.matmul %8, %7, %cst_8 {dimension_numbers = #tpu.dot_dimension_numbers<[1], [0], [0], [1], [0, 0, 1, 1], [], []>} : vector<7x7xf32>, vector<7x128xf32>, vector<7x128xf32> -> vector<7x128xf32>
    %c0_9 = arith.constant 0 : index
    %c0_10 = arith.constant 0 : index
    %10 = vector.load %arg5[%c0_9, %c0_10] : memref<7x1xf32, #tpu.memory_space<vmem>>, vector<7x1xf32>
    %11 = vector.broadcast %10 : vector<7x1xf32> to vector<7x128xf32>
    %12 = arith.addf %9, %11 : vector<7x128xf32>
    %cst_11 = arith.constant 0.000000e+00 : f32
    %13 = vector.broadcast %cst_11 : f32 to vector<7x128xf32>
    %14 = arith.maximumf %12, %13 : vector<7x128xf32>
    %c0_12 = arith.constant 0 : index
    %c0_13 = arith.constant 0 : index
    %15 = vector.load %arg6[%c0_12, %c0_13] : memref<1x7xf32, #tpu.memory_space<vmem>>, vector<1x7xf32>
    %cst_14 = arith.constant dense<0.000000e+00> : vector<1x128xf32>
    %16 = tpu.matmul %15, %14, %cst_14 {dimension_numbers = #tpu.dot_dimension_numbers<[1], [0], [0], [1], [0, 0, 1, 1], [], []>} : vector<1x7xf32>, vector<7x128xf32>, vector<1x128xf32> -> vector<1x128xf32>
    %c0_15 = arith.constant 0 : index
    %c0_16 = arith.constant 0 : index
    %17 = vector.load %arg7[%c0_15, %c0_16] : memref<1x1xf32, #tpu.memory_space<vmem>>, vector<1x1xf32>
    %18 = vector.broadcast %17 : vector<1x1xf32> to vector<1x128xf32>
    %19 = arith.addf %16, %18 : vector<1x128xf32>
    %c0_17 = arith.constant 0 : index
    %c0_18 = arith.constant 0 : index
    %20 = vector.load %arg8[%c0_17, %c0_18] : memref<1x128xf32, #tpu.memory_space<vmem>>, vector<1x128xf32>
    tpu.vector_store %arg8[%c0_17, %c0_18], %19 {strides = array<i32>} : memref<1x128xf32, #tpu.memory_space<vmem>>, vector<1x128xf32>,
    return
  }
  func.func @transform_0(%arg0: i32) -> (i32, i32) {
    %c0_i32 = arith.constant 0 : i32
    %c0_i32_0 = arith.constant 0 : i32
    return %c0_i32, %arg0 : i32, i32
  }
  func.func @transform_1(%arg0: i32) -> (i32, i32) {
    %c0_i32 = arith.constant 0 : i32
    %c0_i32_0 = arith.constant 0 : i32
    %c0_i32_1 = arith.constant 0 : i32
    return %c0_i32, %c0_i32_0 : i32, i32
  }
  func.func @transform_2(%arg0: i32) -> (i32, i32) {
    %c0_i32 = arith.constant 0 : i32
    %c0_i32_0 = arith.constant 0 : i32
    %c0_i32_1 = arith.constant 0 : i32
    return %c0_i32, %c0_i32_0 : i32, i32
  }
  func.func @transform_3(%arg0: i32) -> (i32, i32) {
    %c0_i32 = arith.constant 0 : i32
    %c0_i32_0 = arith.constant 0 : i32
    %c0_i32_1 = arith.constant 0 : i32
    return %c0_i32, %c0_i32_0 : i32, i32
  }
  func.func @transform_4(%arg0: i32) -> (i32, i32) {
    %c0_i32 = arith.constant 0 : i32
    %c0_i32_0 = arith.constant 0 : i32
    %c0_i32_1 = arith.constant 0 : i32
    return %c0_i32, %c0_i32_0 : i32, i32
  }
  func.func @transform_5(%arg0: i32) -> (i32, i32) {
    %c0_i32 = arith.constant 0 : i32
    %c0_i32_0 = arith.constant 0 : i32
    %c0_i32_1 = arith.constant 0 : i32
    return %c0_i32, %c0_i32_0 : i32, i32
  }
  func.func @transform_6(%arg0: i32) -> (i32, i32) {
    %c0_i32 = arith.constant 0 : i32
    %c0_i32_0 = arith.constant 0 : i32
    %c0_i32_1 = arith.constant 0 : i32
    return %c0_i32, %c0_i32_0 : i32, i32
  }
  func.func @transform_7(%arg0: i32) -> (i32, i32) {
    %c0_i32 = arith.constant 0 : i32
    %c0_i32_0 = arith.constant 0 : i32
    return %c0_i32, %arg0 : i32, i32
  }
}

</mosaic_0001>

<bundles_post_ra>
// kernel: classificador_forward.1
= control target key start
LH: loop header
LB: loop body
LE: loop exit
PB: predicated region body
PF: predicated region fallthrough
CT: control target
= control target key end

     0   :  { %vm41_vm0 = vcmask 1043456   ;;  %v335_v0 = vmov 0.0|0.0   ;;  %vm336_vm1 = vmmov 1   ;;  %vm337_vm3 = vmmov 0   ;;  %s414_s0 = inlined_call_operand.vmem [shape: f32[12,128], index: 0, kind: input, shape index: {}]   ;;  %s415_s2 = inlined_call_operand.vmem [shape: f32[7,1], index: 2, kind: input, shape index: {}]   ;;  %s416_s1 = inlined_call_operand.vmem [shape: f32[7,12], index: 1, kind: input, shape index: {}]   ;;  %s417_s4 = inlined_call_operand.vmem [shape: f32[7,1], index: 4, kind: input, shape index: {}]   ;;  %s418_s3 = inlined_call_operand.vmem [shape: f32[7,7], index: 3, kind: input, shape index: {}]   ;;  %s419_s6 = inlined_call_operand.<no memory space> [shape: f32[1,1], index: 6, kind: input, shape index: {}]   ;;  %s420_s5 = inlined_call_operand.vmem [shape: f32[1,7], index: 5, kind: input, shape index: {}]   ;;  %s421_s7 = inlined_call_operand.vmem [shape: f32[1,128], index: 7, kind: output, shape index: {}]  }
   0x1   :  { %324 = vmatprep.subr.bf16.mxu0 %v335_v0  ;;  %v28_v1 = vld [vmem:[%s414_s0] sm:$0xff]  ;;  %v29_v2 = vld [vmem:[%s414_s0 + $0x8] sm:$0xf]  ;;  %vm326_vm2 = vmpackc.low %vm41_vm0, %vm336_vm1  ;;  %v338_v4 = vmov 0.0   ;;  %v339_v5 = vmov 0   ;;  %vm37_vm4 = vcmask 97280   ;;  %v12_v15 = vstv %s419_s6 }
   0x2   :  { %v325_v3 = vpack.c.bf16 %v29_v2, %v28_v1  ;;  %311 = vmatprep.mubr.msk.f32.mxu0 %vm337_vm3, %v338_v4  ;;  %333 = vset.pattern.permute.xlu0 %v339_v5  ;;  %v31_v6 = vld [vmem:[%s415_s2] sm:$0x7f]  ;;  %vm127_vm5 = vcmask 1046528   ;;  %vm123_vm6 = vcmask 56320   ;;  %13 = vst [vmem:[#allocation2] sm:$0x1] %v12_v15  ;;  %v209_v23 = vlaneseq }
   0x3   :  { %34 = vperm.xlu0 %333, %v31_v6   ;;  %314 = vmatprep.subr.mxu1 %v338_v4  ;;  %v30_v7 = vld [vmem:[%s416_s1] sm:$0x7f] }
   0x4   :  { %327 = vmatpush3.bf16.msk.msra.mxu0 %vm326_vm2, %v325_v3  ;;  %v117_v8 = vld [vmem:[%s417_s4] sm:$0x7f]  ;;  %316 = vmatprep.mubr.msk.f32.mxu1 %vm337_vm3, %v338_v4  ;;  %v210_v24 = vshrl.u32 %v209_v23, 7 }
   0x5   :  { %334 = vset.pattern.permute.xlu1 %v339_v5  ;;  %v116_v14 = vld [vmem:[%s418_s3] sm:$0x7f] }
   0x6   :  { %v202_v22 = vld [vmem:[%s420_s5] sm:$0x1]  ;;  %v211_v25 = vsub.s32 0, %v210_v24 }
   0x7   :  { %312 = vmatmul.mubr.msk.f32.vlgmr.msra.gmra.mrb[0].mxu0 %vm37_vm4, %v30_v7  ;;  %120 = vperm.xlu0 %333, %v117_v8  }
   0x9   :  { %v203_v16 = vld [vmem:[#allocation2] sm:$0x1] }
   0xa   :  { %206 = vperm.xlu1 %334, %v203_v16  }
  0x82   :  { %v35_v9 = vpop.permute.xlu0 %34 }
  0x86   :  { %v121_v17 = vpop.permute.xlu0 %120 }
  0x89   :  { %v207_v26 = vpop.permute.xlu1 %206 }
  0x8a   :  { %v212_v27 = vrot.slane %v207_v26, %v211_v25 }
  0xda   :  { %v111_v10 = vpop.f32.mrb[0].mxu0 }
  0xdb   :  { %v112_v11 = vadd.f32 %v111_v10, %v35_v9  ;;  %v313_v12 = vpop.f32.mrb[1].mxu0 }
  0xdd   :  { %v115_v13 = vmax.f32 %v112_v11, 0.0 }
  0xdf   :  { %315 = vmatpush3.msk.msra.mxu1 %vm127_vm5, %v115_v13 }
  0xe0   :  { %317 = vmatmul.mubr.msk.f32.vlgmr.msra.gmra.mrb[0].mxu1 %vm123_vm6, %v116_v14  ;;  %319 = vmatprep.subr.mxu1 %v338_v4 }
  0xe1   :  { %321 = vmatprep.mubr.msk.f32.mxu1 %vm337_vm3, %v338_v4 }
 0x1b3   :  { %v197_v18 = vpop.f32.mrb[0].mxu1 }
 0x1b4   :  { %v198_v19 = vadd.f32 %v197_v18, %v121_v17  ;;  %v318_v20 = vpop.f32.mrb[1].mxu1 }
 0x1b6   :  { %v201_v21 = vmax.f32 %v198_v19, 0.0 }
 0x1b8   :  { %320 = vmatpush3.msk.msra.mxu1 %vm127_vm5, %v201_v21 }
 0x1b9   :  { %322 = vmatmul.mubr.msk.f32.vlgmr.msra.gmra.mrb[2].mxu1 %vm123_vm6, %v202_v22 }
 0x28c   :  { %v285_v28 = vpop.f32.mrb[2].mxu1 }
 0x28d   :  { %v286_v29 = vadd.f32 %v285_v28, %v212_v27  ;;  %v323_v30 = vpop.f32.mrb[3].mxu1 }
 0x28f   :  { %289 = vst [vmem:[%s421_s7] sm:$0x1] %v286_v29 }

</bundles_post_ra>
